<compile_context>
chip_gen: v6e
topology: v6e:2x2x1
jax: 0.10.0
libtpu: 0.0.40
codegen_flags: <defaults>
</compile_context>

<pallas_src>
import jax
import jax.numpy as jnp
from jax.experimental import pallas as pl
from jax.experimental.pallas import tpu as pltpu


def _lstm_seq_kernel(x_ref, w_ref, u_ref, b_ref, h0_ref, c0_ref,
                     h_out_ref, c_out_ref,
                     h_sc, c_sc, b_sc):
    t = pl.program_id(0)
    H = c0_ref.shape[1]

    @pl.when(t == 0)
    def _():
        # Load initial state into the f32 carry scratch and hoist the f32 bias
        # broadcast out of the time loop (done exactly once).
        h_sc[...] = h0_ref[...].astype(jnp.float32)
        c_sc[...] = c0_ref[...].astype(jnp.float32)
        b_sc[...] = jnp.broadcast_to(b_ref[...].astype(jnp.float32), b_sc.shape)

    x_t = x_ref[0]            # (B, I) bf16, this step's input (streamed block)
    h_prev = h_sc[...]        # (B, H) f32 carried state
    c_prev = c_sc[...]        # (B, H) f32 carried state

    # Two MXU matmuls (K=I and K=H), f32 accumulation; weights are resident.
    z = (jnp.dot(x_t, w_ref[...], preferred_element_type=jnp.float32)
         + jnp.dot(h_prev.astype(w_ref.dtype), u_ref[...],
                   preferred_element_type=jnp.float32)
         + b_sc[...])

    # H is a multiple of 128 -> gate slices are lane-tile-aligned views.
    zi = z[:, 0 * H:1 * H]
    zf = z[:, 1 * H:2 * H]
    zo = z[:, 2 * H:3 * H]
    zg = z[:, 3 * H:4 * H]

    # sigmoid(x) = 0.5 * tanh(0.5*x) + 0.5  (1 EUP push instead of exp+div).
    i_gate = 0.5 * jnp.tanh(0.5 * zi) + 0.5
    f_gate = 0.5 * jnp.tanh(0.5 * zf) + 0.5
    o_gate = 0.5 * jnp.tanh(0.5 * zo) + 0.5
    g_gate = jnp.tanh(zg)

    c_new = f_gate * c_prev + i_gate * g_gate
    h_new = o_gate * jnp.tanh(c_new)

    # Carry states in f32 scratch across grid iterations.
    c_sc[...] = c_new
    h_sc[...] = h_new

    # Per-step outputs via t-indexed blocks; downcast only at the store.
    h_out_ref[0] = h_new.astype(h_out_ref.dtype)
    c_out_ref[0] = c_new.astype(c_out_ref.dtype)


def lstm_sequence_pallas(x_seq, h0, c0, W, U, b):
    """Run the LSTM cell over a sequence.

    x_seq:[T,B,I], h0/c0:[B,H], W:[I,4H], U:[H,4H], b:[1,4H]
    -> (h_seq, c_seq), each [T,B,H] (h_seq[-1], c_seq[-1] are the final state).
    """
    T, B, I = x_seq.shape
    H = h0.shape[1]
    assert W.shape == (I, 4 * H) and U.shape == (H, 4 * H) and b.shape == (1, 4 * H)
    assert c0.shape == (B, H)

    grid_spec = pltpu.PrefetchScalarGridSpec(
        num_scalar_prefetch=0,
        grid=(T,),
        in_specs=[
            pl.BlockSpec((1, B, I), lambda t: (t, 0, 0)),    # x_t  (streamed)
            pl.BlockSpec((I, 4 * H), lambda t: (0, 0)),      # W    (VMEM-resident)
            pl.BlockSpec((H, 4 * H), lambda t: (0, 0)),      # U    (VMEM-resident)
            pl.BlockSpec((1, 4 * H), lambda t: (0, 0)),      # b    (VMEM-resident)
            pl.BlockSpec((B, H), lambda t: (0, 0)),          # h0
            pl.BlockSpec((B, H), lambda t: (0, 0)),          # c0
        ],
        out_specs=(
            pl.BlockSpec((1, B, H), lambda t: (t, 0, 0)),    # h per step
            pl.BlockSpec((1, B, H), lambda t: (t, 0, 0)),    # c per step
        ),
        scratch_shapes=[
            pltpu.VMEM((B, H), jnp.float32),       # carried h
            pltpu.VMEM((B, H), jnp.float32),       # carried c (f32 across steps)
            pltpu.VMEM((B, 4 * H), jnp.float32),   # hoisted f32 bias broadcast
        ],
    )
    h_seq, c_seq = pl.pallas_call(
        _lstm_seq_kernel,
        out_shape=(jax.ShapeDtypeStruct((T, B, H), x_seq.dtype),
                   jax.ShapeDtypeStruct((T, B, H), x_seq.dtype)),
        grid_spec=grid_spec,
        compiler_params=pltpu.CompilerParams(
            dimension_semantics=("arbitrary",)),   # recurrence -> sequential axis
    )(x_seq, W, U, b, h0, c0)
    return h_seq, c_seq


def lstm_cell_pallas(x, h_prev, c_prev, W, U, b):
    """Single time-step (the module's forward signature): T=1 of the sequence kernel."""
    h_seq, c_seq = lstm_sequence_pallas(x[None], h_prev, c_prev, W, U, b)
    return h_seq[0], c_seq[0]


def xavier_normal(key, shape, dtype):
    fan_in, fan_out = shape
    std = (2.0 / (fan_in + fan_out)) ** 0.5
    return (jax.random.normal(key, shape, jnp.float32) * std).astype(dtype)


def reference_lstm_sequence(x_seq, h0, c0, W, U, b):
    """Pure-JAX reference: same recurrence, f32 gate math, bf16 h fed back, f32 c carried."""
    T = x_seq.shape[0]
    H = h0.shape[1]
    Wf, Uf, bf = W.astype(jnp.float32), U.astype(jnp.float32), b.astype(jnp.float32)
    h = h0
    c = c0.astype(jnp.float32)
    hs, cs = [], []
    for t in range(T):
        z = x_seq[t].astype(jnp.float32) @ Wf + h.astype(jnp.float32) @ Uf + bf
        zi, zf, zo, zg = (z[:, k * H:(k + 1) * H] for k in range(4))
        i = jax.nn.sigmoid(zi)
        f = jax.nn.sigmoid(zf)
        o = jax.nn.sigmoid(zo)
        g = jnp.tanh(zg)
        c = f * c + i * g
        h_f32 = o * jnp.tanh(c)
        h = h_f32.astype(x_seq.dtype)
        hs.append(h)
        cs.append(c.astype(x_seq.dtype))
    return jnp.stack(hs), jnp.stack(cs)


if __name__ == "__main__":
    # Small shapes consistent with the module: batch=8, input=64, hidden=128, seq=8.
    batch_size, input_size, hidden_size, seq_len = 8, 64, 128, 8
    dtype = jnp.bfloat16  # native MXU dtype instead of torch.float16; f32 accum.

    key = jax.random.PRNGKey(0)
    keys = jax.random.split(key, 12)

    # Parameter init mirroring the module: xavier_normal_ weights, ones biases.
    Wi = xavier_normal(keys[0], (input_size, hidden_size), dtype)
    Wf = xavier_normal(keys[1], (input_size, hidden_size), dtype)
    Wo = xavier_normal(keys[2], (input_size, hidden_size), dtype)
    Wg = xavier_normal(keys[3], (input_size, hidden_size), dtype)
    Ui = xavier_normal(keys[4], (hidden_size, hidden_size), dtype)
    Uf = xavier_normal(keys[5], (hidden_size, hidden_size), dtype)
    Uo = xavier_normal(keys[6], (hidden_size, hidden_size), dtype)
    Ug = xavier_normal(keys[7], (hidden_size, hidden_size), dtype)
    bi = jnp.ones((hidden_size,), dtype)
    bf = jnp.ones((hidden_size,), dtype)
    bo = jnp.ones((hidden_size,), dtype)
    bg = jnp.ones((hidden_size,), dtype)

    # One-time glue at init (outside the hot path): per-gate weights stacked
    # along the output axis in the module's own (i, f, o, g) order.
    # NOTE: this order matches this module's Wi/Wf/Wo/Wg, NOT torch.nn.LSTMCell's
    # (i, f, g, o) checkpoint packing.
    W = jnp.concatenate([Wi, Wf, Wo, Wg], axis=1)      # [I, 4H]
    U = jnp.concatenate([Ui, Uf, Uo, Ug], axis=1)      # [H, 4H]
    b = jnp.concatenate([bi, bf, bo, bg])[None, :]     # [1, 4H]

    # Inputs: a sequence of x plus initial (h, c).  state_now in the PyTorch
    # module is just a preallocated output buffer; the kernel returns fresh
    # per-step (h, c) outputs instead.
    x_seq = jax.random.normal(keys[8], (seq_len, batch_size, input_size),
                              jnp.float32).astype(dtype)
    h0 = jax.random.normal(keys[9], (batch_size, hidden_size), jnp.float32).astype(dtype)
    c0 = jax.random.normal(keys[10], (batch_size, hidden_size), jnp.float32).astype(dtype)

    # Sequence kernel (hot path: weights resident, state carried in VMEM).
    h_seq, c_seq = lstm_sequence_pallas(x_seq, h0, c0, W, U, b)
    jax.block_until_ready((h_seq, c_seq))

    h_ref, c_ref = reference_lstm_sequence(x_seq, h0, c0, W, U, b)
    assert h_seq.shape == (seq_len, batch_size, hidden_size) and h_seq.dtype == dtype
    assert c_seq.shape == (seq_len, batch_size, hidden_size) and c_seq.dtype == dtype
    assert jnp.allclose(h_seq.astype(jnp.float32), h_ref.astype(jnp.float32),
                        atol=2e-2, rtol=2e-2)
    assert jnp.allclose(c_seq.astype(jnp.float32), c_ref.astype(jnp.float32),
                        atol=2e-2, rtol=2e-2)

    # Single-step path (the module's forward signature), verified too.
    h1, c1 = lstm_cell_pallas(x_seq[0], h0, c0, W, U, b)
    jax.block_until_ready((h1, c1))
    assert jnp.allclose(h1.astype(jnp.float32), h_ref[0].astype(jnp.float32),
                        atol=2e-2, rtol=2e-2)
    assert jnp.allclose(c1.astype(jnp.float32), c_ref[0].astype(jnp.float32),
                        atol=2e-2, rtol=2e-2)

    print("KERNEL_OK")
</pallas_src>

<mosaic_0001>
module attributes {stable_mosaic.version = 11 : i64} {
  func.func @_lstm_seq_kernel(%arg0: i32, %arg1: memref<1x8x64xbf16, #tpu.memory_space<vmem>>, %arg2: memref<64x512xbf16, #tpu.memory_space<vmem>>, %arg3: memref<128x512xbf16, #tpu.memory_space<vmem>>, %arg4: memref<1x512xbf16, #tpu.memory_space<vmem>>, %arg5: memref<8x128xbf16, #tpu.memory_space<vmem>>, %arg6: memref<8x128xbf16, #tpu.memory_space<vmem>>, %arg7: memref<1x8x128xbf16, #tpu.memory_space<vmem>>, %arg8: memref<1x8x128xbf16, #tpu.memory_space<vmem>>, %arg9: memref<8x128xf32, #tpu.memory_space<vmem>>, %arg10: memref<8x128xf32, #tpu.memory_space<vmem>>, %arg11: memref<8x512xf32, #tpu.memory_space<vmem>>) attributes {dimension_semantics = [#tpu.dimension_semantics<arbitrary>], iteration_bounds = array<i64: 8>, scalar_prefetch = 0 : i64, scratch_operands = 3 : i64, tpu.core_type = #tpu.core_type<tc>, window_params = [{transform_indices = @transform_0, window_bounds = array<i64: 1, 8, 64>}, {pipeline_mode = #tpu.pipeline_mode<synchronous>, transform_indices = @transform_1, window_bounds = array<i64: 64, 512>}, {pipeline_mode = #tpu.pipeline_mode<synchronous>, transform_indices = @transform_2, window_bounds = array<i64: 128, 512>}, {pipeline_mode = #tpu.pipeline_mode<synchronous>, transform_indices = @transform_3, window_bounds = array<i64: 1, 512>}, {pipeline_mode = #tpu.pipeline_mode<synchronous>, transform_indices = @transform_4, window_bounds = array<i64: 8, 128>}, {pipeline_mode = #tpu.pipeline_mode<synchronous>, transform_indices = @transform_5, window_bounds = array<i64: 8, 128>}, {transform_indices = @transform_6, window_bounds = array<i64: 1, 8, 128>}, {transform_indices = @transform_7, window_bounds = array<i64: 1, 8, 128>}]} {
    %c0_i32 = arith.constant 0 : i32
    %0 = arith.cmpi eq, %arg0, %c0_i32 : i32
    %1 = arith.extui %0 : i1 to i32
    %c0_i32_0 = arith.constant 0 : i32
    %2 = arith.cmpi ne, %1, %c0_i32_0 : i32
    scf.if %2 {
      %c0_33 = arith.constant 0 : index
      %c0_34 = arith.constant 0 : index
      %56 = vector.load %arg5[%c0_33, %c0_34] : memref<8x128xbf16, #tpu.memory_space<vmem>>, vector<8x128xbf16>
      %57 = arith.extf %56 : vector<8x128xbf16> to vector<8x128xf32>
      %c0_35 = arith.constant 0 : index
      %c0_36 = arith.constant 0 : index
      %58 = vector.load %arg9[%c0_35, %c0_36] : memref<8x128xf32, #tpu.memory_space<vmem>>, vector<8x128xf32>
      tpu.vector_store %arg9[%c0_35, %c0_36], %57 {strides = array<i32>} : memref<8x128xf32, #tpu.memory_space<vmem>>, vector<8x128xf32>,
      %c0_37 = arith.constant 0 : index
      %c0_38 = arith.constant 0 : index
      %59 = vector.load %arg6[%c0_37, %c0_38] : memref<8x128xbf16, #tpu.memory_space<vmem>>, vector<8x128xbf16>
      %60 = arith.extf %59 : vector<8x128xbf16> to vector<8x128xf32>
      %c0_39 = arith.constant 0 : index
      %c0_40 = arith.constant 0 : index
      %61 = vector.load %arg10[%c0_39, %c0_40] : memref<8x128xf32, #tpu.memory_space<vmem>>, vector<8x128xf32>
      tpu.vector_store %arg10[%c0_39, %c0_40], %60 {strides = array<i32>} : memref<8x128xf32, #tpu.memory_space<vmem>>, vector<8x128xf32>,
      %c0_41 = arith.constant 0 : index
      %c0_42 = arith.constant 0 : index
      %62 = vector.load %arg4[%c0_41, %c0_42] : memref<1x512xbf16, #tpu.memory_space<vmem>>, vector<1x512xbf16>
      %63 = arith.extf %62 : vector<1x512xbf16> to vector<1x512xf32>
      %64 = vector.shape_cast %63 : vector<1x512xf32> to vector<1x512xf32>
      %65 = vector.broadcast %64 : vector<1x512xf32> to vector<8x512xf32>
      %c0_43 = arith.constant 0 : index
      %c0_44 = arith.constant 0 : index
      %66 = vector.load %arg11[%c0_43, %c0_44] : memref<8x512xf32, #tpu.memory_space<vmem>>, vector<8x512xf32>
      tpu.vector_store %arg11[%c0_43, %c0_44], %65 {strides = array<i32>} : memref<8x512xf32, #tpu.memory_space<vmem>>, vector<8x512xf32>,
    } else {
    }
    %c0 = arith.constant 0 : index
    %c0_1 = arith.constant 0 : index
    %c0_2 = arith.constant 0 : index
    %3 = vector.load %arg1[%c0, %c0_1, %c0_2] : memref<1x8x64xbf16, #tpu.memory_space<vmem>>, vector<1x8x64xbf16>
    %4 = vector.shape_cast %3 : vector<1x8x64xbf16> to vector<8x64xbf16>
    %c0_3 = arith.constant 0 : index
    %c0_4 = arith.constant 0 : index
    %5 = vector.load %arg9[%c0_3, %c0_4] : memref<8x128xf32, #tpu.memory_space<vmem>>, vector<8x128xf32>
    %c0_5 = arith.constant 0 : index
    %c0_6 = arith.constant 0 : index
    %6 = vector.load %arg10[%c0_5, %c0_6] : memref<8x128xf32, #tpu.memory_space<vmem>>, vector<8x128xf32>
    %c0_7 = arith.constant 0 : index
    %c0_8 = arith.constant 0 : index
    %7 = vector.load %arg2[%c0_7, %c0_8] : memref<64x512xbf16, #tpu.memory_space<vmem>>, vector<64x512xbf16>
    %cst = arith.constant dense<0.000000e+00> : vector<8x512xf32>
    %8 = tpu.matmul %4, %7, %cst {dimension_numbers = #tpu.dot_dimension_numbers<[1], [0], [0], [1], [0, 0, 1, 1], [], []>} : vector<8x64xbf16>, vector<64x512xbf16>, vector<8x512xf32> -> vector<8x512xf32>
    %9 = arith.truncf %5 : vector<8x128xf32> to vector<8x128xbf16>
    %c0_9 = arith.constant 0 : index
    %c0_10 = arith.constant 0 : index
    %10 = vector.load %arg3[%c0_9, %c0_10] : memref<128x512xbf16, #tpu.memory_space<vmem>>, vector<128x512xbf16>
    %cst_11 = arith.constant dense<0.000000e+00> : vector<8x512xf32>
    %11 = tpu.matmul %9, %10, %cst_11 {dimension_numbers = #tpu.dot_dimension_numbers<[1], [0], [0], [1], [0, 0, 1, 1], [], []>} : vector<8x128xbf16>, vector<128x512xbf16>, vector<8x512xf32> -> vector<8x512xf32>
    %12 = arith.addf %8, %11 : vector<8x512xf32>
    %c0_12 = arith.constant 0 : index
    %c0_13 = arith.constant 0 : index
    %13 = vector.load %arg11[%c0_12, %c0_13] : memref<8x512xf32, #tpu.memory_space<vmem>>, vector<8x512xf32>
    %14 = arith.addf %12, %13 : vector<8x512xf32>
    %15 = vector.extract_strided_slice %14 {offsets = [0, 0], sizes = [8, 128], strides = [1, 1]} : vector<8x512xf32> to vector<8x128xf32>
    %16 = vector.extract_strided_slice %14 {offsets = [0, 128], sizes = [8, 128], strides = [1, 1]} : vector<8x512xf32> to vector<8x128xf32>
    %17 = vector.extract_strided_slice %14 {offsets = [0, 256], sizes = [8, 128], strides = [1, 1]} : vector<8x512xf32> to vector<8x128xf32>
    %18 = vector.extract_strided_slice %14 {offsets = [0, 384], sizes = [8, 128], strides = [1, 1]} : vector<8x512xf32> to vector<8x128xf32>
    %cst_14 = arith.constant 5.000000e-01 : f32
    %19 = vector.broadcast %cst_14 : f32 to vector<8x128xf32>
    %20 = arith.mulf %19, %15 : vector<8x128xf32>
    %21 = math.tanh %20 : vector<8x128xf32>
    %cst_15 = arith.constant 5.000000e-01 : f32
    %22 = vector.broadcast %cst_15 : f32 to vector<8x128xf32>
    %23 = arith.mulf %22, %21 : vector<8x128xf32>
    %cst_16 = arith.constant 5.000000e-01 : f32
    %24 = vector.broadcast %cst_16 : f32 to vector<8x128xf32>
    %25 = arith.addf %23, %24 : vector<8x128xf32>
    %cst_17 = arith.constant 5.000000e-01 : f32
    %26 = vector.broadcast %cst_17 : f32 to vector<8x128xf32>
    %27 = arith.mulf %26, %16 : vector<8x128xf32>
    %28 = math.tanh %27 : vector<8x128xf32>
    %cst_18 = arith.constant 5.000000e-01 : f32
    %29 = vector.broadcast %cst_18 : f32 to vector<8x128xf32>
    %30 = arith.mulf %29, %28 : vector<8x128xf32>
    %cst_19 = arith.constant 5.000000e-01 : f32
    %31 = vector.broadcast %cst_19 : f32 to vector<8x128xf32>
    %32 = arith.addf %30, %31 : vector<8x128xf32>
    %cst_20 = arith.constant 5.000000e-01 : f32
    %33 = vector.broadcast %cst_20 : f32 to vector<8x128xf32>
    %34 = arith.mulf %33, %17 : vector<8x128xf32>
    %35 = math.tanh %34 : vector<8x128xf32>
    %cst_21 = arith.constant 5.000000e-01 : f32
    %36 = vector.broadcast %cst_21 : f32 to vector<8x128xf32>
    %37 = arith.mulf %36, %35 : vector<8x128xf32>
    %cst_22 = arith.constant 5.000000e-01 : f32
    %38 = vector.broadcast %cst_22 : f32 to vector<8x128xf32>
    %39 = arith.addf %37, %38 : vector<8x128xf32>
    %40 = math.tanh %18 : vector<8x128xf32>
    %41 = arith.mulf %32, %6 : vector<8x128xf32>
    %42 = arith.mulf %25, %40 : vector<8x128xf32>
    %43 = arith.addf %41, %42 : vector<8x128xf32>
    %44 = math.tanh %43 : vector<8x128xf32>
    %45 = arith.mulf %39, %44 : vector<8x128xf32>
    %c0_23 = arith.constant 0 : index
    %c0_24 = arith.constant 0 : index
    %46 = vector.load %arg10[%c0_23, %c0_24] : memref<8x128xf32, #tpu.memory_space<vmem>>, vector<8x128xf32>
    tpu.vector_store %arg10[%c0_23, %c0_24], %43 {strides = array<i32>} : memref<8x128xf32, #tpu.memory_space<vmem>>, vector<8x128xf32>,
    %c0_25 = arith.constant 0 : index
    %c0_26 = arith.constant 0 : index
    %47 = vector.load %arg9[%c0_25, %c0_26] : memref<8x128xf32, #tpu.memory_space<vmem>>, vector<8x128xf32>
    tpu.vector_store %arg9[%c0_25, %c0_26], %45 {strides = array<i32>} : memref<8x128xf32, #tpu.memory_space<vmem>>, vector<8x128xf32>,
    %48 = arith.truncf %45 : vector<8x128xf32> to vector<8x128xbf16>
    %c0_27 = arith.constant 0 : index
    %c0_28 = arith.constant 0 : index
    %c0_29 = arith.constant 0 : index
    %49 = vector.load %arg7[%c0_27, %c0_28, %c0_29] : memref<1x8x128xbf16, #tpu.memory_space<vmem>>, vector<1x8x128xbf16>
    %50 = vector.shape_cast %49 : vector<1x8x128xbf16> to vector<8x128xbf16>
    %51 = vector.shape_cast %48 : vector<8x128xbf16> to vector<1x8x128xbf16>
    tpu.vector_store %arg7[%c0_27, %c0_28, %c0_29], %51 {strides = array<i32>} : memref<1x8x128xbf16, #tpu.memory_space<vmem>>, vector<1x8x128xbf16>,
    %52 = arith.truncf %43 : vector<8x128xf32> to vector<8x128xbf16>
    %c0_30 = arith.constant 0 : index
    %c0_31 = arith.constant 0 : index
    %c0_32 = arith.constant 0 : index
    %53 = vector.load %arg8[%c0_30, %c0_31, %c0_32] : memref<1x8x128xbf16, #tpu.memory_space<vmem>>, vector<1x8x128xbf16>
    %54 = vector.shape_cast %53 : vector<1x8x128xbf16> to vector<8x128xbf16>
    %55 = vector.shape_cast %52 : vector<8x128xbf16> to vector<1x8x128xbf16>
    tpu.vector_store %arg8[%c0_30, %c0_31, %c0_32], %55 {strides = array<i32>} : memref<1x8x128xbf16, #tpu.memory_space<vmem>>, vector<1x8x128xbf16>,
    return
  }
  func.func @transform_0(%arg0: i32) -> (i32, i32, i32) {
    %c0_i32 = arith.constant 0 : i32
    %c0_i32_0 = arith.constant 0 : i32
    %c0_i32_1 = arith.constant 0 : i32
    return %arg0, %c0_i32, %c0_i32_0 : i32, i32, i32
  }
  func.func @transform_1(%arg0: i32) -> (i32, i32) {
    %c0_i32 = arith.constant 0 : i32
    %c0_i32_0 = arith.constant 0 : i32
    %c0_i32_1 = arith.constant 0 : i32
    return %c0_i32, %c0_i32_0 : i32, i32
  }
  func.func @transform_2(%arg0: i32) -> (i32, i32) {
    %c0_i32 = arith.constant 0 : i32
    %c0_i32_0 = arith.constant 0 : i32
    %c0_i32_1 = arith.constant 0 : i32
    return %c0_i32, %c0_i32_0 : i32, i32
  }
  func.func @transform_3(%arg0: i32) -> (i32, i32) {
    %c0_i32 = arith.constant 0 : i32
    %c0_i32_0 = arith.constant 0 : i32
    %c0_i32_1 = arith.constant 0 : i32
    return %c0_i32, %c0_i32_0 : i32, i32
  }
  func.func @transform_4(%arg0: i32) -> (i32, i32) {
    %c0_i32 = arith.constant 0 : i32
    %c0_i32_0 = arith.constant 0 : i32
    %c0_i32_1 = arith.constant 0 : i32
    return %c0_i32, %c0_i32_0 : i32, i32
  }
  func.func @transform_5(%arg0: i32) -> (i32, i32) {
    %c0_i32 = arith.constant 0 : i32
    %c0_i32_0 = arith.constant 0 : i32
    %c0_i32_1 = arith.constant 0 : i32
    return %c0_i32, %c0_i32_0 : i32, i32
  }
  func.func @transform_6(%arg0: i32) -> (i32, i32, i32) {
    %c0_i32 = arith.constant 0 : i32
    %c0_i32_0 = arith.constant 0 : i32
    %c0_i32_1 = arith.constant 0 : i32
    return %arg0, %c0_i32, %c0_i32_0 : i32, i32, i32
  }
  func.func @transform_7(%arg0: i32) -> (i32, i32, i32) {
    %c0_i32 = arith.constant 0 : i32
    %c0_i32_0 = arith.constant 0 : i32
    %c0_i32_1 = arith.constant 0 : i32
    return %arg0, %c0_i32, %c0_i32_0 : i32, i32, i32
  }
}

</mosaic_0001>

<bundles_post_ra>
// kernel: tpu_custom_call.1
= control target key start
LH: loop header
LB: loop body
LE: loop exit
PB: predicated region body
PF: predicated region fallthrough
CT: control target
= control target key end

     0   :  { %s1777_s0 = inlined_call_operand.hbm [shape: bf16[8,8,64], index: 0, kind: input, shape index: {}]   ;;  %s1778_s1 = inlined_call_operand.hbm [shape: bf16[64,512], index: 1, kind: input, shape index: {}]   ;;  %s1779_s2 = inlined_call_operand.hbm [shape: bf16[128,512], index: 2, kind: input, shape index: {}]   ;;  %s1780_s3 = inlined_call_operand.vmem [shape: bf16[1,512], index: 3, kind: input, shape index: {}]   ;;  %s1781_s4 = inlined_call_operand.hbm [shape: bf16[8,128], index: 4, kind: input, shape index: {}]   ;;  %s1782_s5 = inlined_call_operand.vmem [shape: bf16[8,128], index: 5, kind: input, shape index: {}]   ;;  %s1783_s6 = inlined_call_operand.hbm [shape: bf16[8,8,128], index: 6, kind: output, shape index: {0}]   ;;  %s1784_s7 = inlined_call_operand.hbm [shape: bf16[8,8,128], index: 7, kind: output, shape index: {1}]  }
   0x1   :  { %1790 = sst [smem:[#allocation21_spill]] %s1778_s1 }
   0x2   :  { %1791 = sst [smem:[#allocation22_spill]] %s1779_s2 }
   0x3   :  { %13 = vsyncpa [#allocation6], 0 }
   0x4   :  { %15 = vsyncpa [#allocation6 + $0x1], 0 }
   0x5   :  { %16 = vsyncpa [#allocation9], 0 }
   0x6   :  { %17 = vsyncpa [#allocation12], 0 }
   0x7   :  { %18 = vsyncpa [#allocation7], 0 }
   0x8   :  { %20 = vsyncpa [#allocation7 + $0x1], 0 }
   0x9   :  { %21 = vsyncpa [#allocation15], 0 }
   0xa   :  { %23 = vsyncpa [#allocation15 + $0x1], 0  ;;  %s1554_s24 = smov 0   ;;  %s1556_s25 = smov 0  }
   0xb   :  { %s1558_s26 = smov 0   ;;  %s1560_s27 = smov 0  }
   0xc LB: > { %s1575_s28 = sadd.s32 4294967295, %s1503_s27   ;;  %s1056_s29 = sadd.s32 4294967294, %s1503_s27   ;;  %s1503_s27 = sphi %s1560_s27, %s1814_s27   ;;  %s1499_s26 = sphi %s1558_s26, %s1813_s26   ;;  %s1495_s25 = sphi %s1556_s25, %s1812_s25   ;;  %s1491_s24 = sphi %s1554_s24, %s1811_s24  }
   0xd   : > { %p49_p0 = scmp.ne.s32.totalorder %s1495_s25, %s1491_s24  ;;  %p1785_p1 = scmp.eq.s32.totalorder %s1575_s28, 0 }
   0xe   : > { %p184_p3 = scmp.eq.s32.totalorder %s1056_s29, 7  ;;  %p1057_p5 = scmp.ge.s32.totalorder %s1503_s27, 1 }
   0xf   : > { %p1584_p4 = por %p1785_p1, %p49_p0  ;;  %p217_p7 = scmp.lt.s32.totalorder %s1503_s27, 9 }
  0x10   : > { %p1589_p6 = por %p184_p3, %p49_p0  ;;  %s1505_s10 = smov [#allocation8]  }
  0x11   : > { %s1792_s30 = scalar_select %p1584_p4, 1, 0 }
  0x12   : > { %s1793_s8 = scalar_select %p1589_p6, 1, 0 }
  0x13   : > { %p1595_p9 = pnand %p1057_p5, %p217_p7  ;;  %s229_s11 = sshll.u32 %s1505_s10, 4  ;;  %s230_s11 = int_to_ptr.vmem [resolvable:$true] %s229_s11 }
  0x14   : > { %s1506_s13 = smov [#allocation10]   ;;  %s1507_s15 = smov [#allocation11]  }
  0x15   : > { %s1794_s9 = scalar_select %p1595_p9, 1, 0 }
  0x16   : > { %p1146_p10 = pneg %p1595_p9  ;;  %s242_s14 = sshll.u32 %s1506_s13, 4  ;;  %s243_s14 = int_to_ptr.vmem [resolvable:$true] %s242_s14 }
  0x17   : > { %s259_s16 = sshll.u32 %s1507_s15, 4  ;;  %s1306_s17 = scalar_lea.vmem %s230_s11, 2048  ;;  %s260_s16 = int_to_ptr.vmem [resolvable:$true] %s259_s16 }
  0x18   : > { %p1603_p11 = pnand %p1146_p10, %p1785_p1  ;;  %p1307_p13 = scmp.ne.s32.totalorder %s230_s11, %s1306_s17 }
  0x19   : > { %p1314_p5 = scmp.lt.s32.totalorder %s230_s11, %s230_s11  ;;  %p1315_p7 = scmp.lt.s32.totalorder %s1306_s17, %s1306_s17 }
  0x1a   : > { %p1297_p12 = pneg %p1603_p11 }
  0x1b   : > { %p1316_p10 = por %p1315_p7, %p1314_p5 }
  0x1c   : > { %p1309_p0 = pnand %p1307_p13, %p1297_p12 }
  0x1e   : > { %p1310_p3 = pneg %p1309_p0 }
  0x20   : > { %p1317_p8 = pnand %p1316_p10, %p1310_p3 }
  0x22   : > { %1320 = shalt.err (!%p1317_p8)
}
  0x23   : > { %s1508_s18 = smov 256   ;;  %s1509_s19 = smov 16  }
  0x24   : > { %s1796_s1 = sld [smem:[#allocation21_spill]]  ;;  %s1332_s22 = scalar_lea.vmem %s243_s14, 4096 }
  0x25   : > { %p1333_p1 = scmp.ne.s32.totalorder %s243_s14, %s1332_s22  ;;  %p1340_p2 = scmp.lt.s32.totalorder %s243_s14, %s243_s14 }
  0x26   : > { %p1341_p6 = scmp.lt.s32.totalorder %s1332_s22, %s1332_s22 }
  0x27   : > { %p1335_p13 = pnand %p1333_p1, %p1297_p12 }
  0x28   : > { %p1342_p5 = por %p1341_p6, %p1340_p2 }
  0x29   : > { %p1336_p0 = pneg %p1335_p13 }
  0x2a   : > { %1149 = dma.hbm_to_vmem [thread:$0]  (!%p1603_p11), %s1796_s1, 2048, %s230_s11, [#allocation9], %s1508_s18, %s1508_s18, %s1509_s19  }
  0x2b   : > { %p1343_p3 = pnand %p1342_p5, %p1336_p0 }
  0x2d   : > { %1346 = shalt.err (!%p1343_p3)
}
  0x2e   : > { %s1797_s2 = sld [smem:[#allocation22_spill]]  ;;  %s1358_s10 = scalar_lea.vmem %s260_s16, 64 }
  0x2f   : > { %p1359_p8 = scmp.ne.s32.totalorder %s260_s16, %s1358_s10  ;;  %p1366_p10 = scmp.lt.s32.totalorder %s260_s16, %s260_s16 }
  0x30   : > { %p1367_p13 = scmp.lt.s32.totalorder %s1358_s10, %s1358_s10 }
  0x31   : > { %p1361_p7 = pnand %p1359_p8, %p1297_p12 }
  0x32   : > { %p1368_p4 = por %p1367_p13, %p1366_p10 }
  0x33   : > { %p1362_p1 = pneg %p1361_p7 }
  0x34   : > { %1152 = dma.hbm_to_vmem [thread:$0]  (!%p1603_p11), %s1797_s2, 4096, %s243_s14, [#allocation9], %s1508_s18, %s1508_s18, %s1509_s19  }
  0x35   : > { %p1369_p2 = pnand %p1368_p4, %p1362_p1 }
  0x37   : > { %1372 = shalt.err (!%p1369_p2)
}
  0x38   : > { %1155 = dma.hbm_to_vmem [thread:$0]  (!%p1603_p11), %s1781_s4, 64, %s260_s16, [#allocation12]  }
  0x39   : > { %s1634_s14 = sadd.s32 1, %s1503_s27   ;;  %s36_s12 = sadd.s32 1, %s1499_s26 }
  0x3a   : > { %s33_s15 = ssub.s32 %s1503_s27, %s1634_s14  ;;  %p43_p6 = scmp.ne.s32.totalorder %s1499_s26, %s1495_s25 }
  0x3b   : > { %p34_p4 = scmp.eq.s32.totalorder %s33_s15, 0  ;;  %p44_p12 = scmp.eq.s32.totalorder %s1503_s27, 0 }
  0x3c   : > { %p1170_p0 = scmp.lt.s32.totalorder %s1503_s27, 8  ;;  %p1798_p3 = scmp.eq.s32.totalorder %s1575_s28, 7 }
  0x3d   : > { %s1644_s17 = scalar_select %p34_p4, %s1499_s26, %s36_s12  }
  0x3e   : > { %p45_p5 = por %p44_p12, %p43_p6  ;;  %p1648_p8 = por %p1798_p3, %p43_p6 }
  0x3f   : > { %s273_s19 = sand.u32 1, %s1499_s26   ;;  %s1063_s20 = sshll.u32 %s1503_s27, 6 }
  0x40   : > { %s1799_s18 = scalar_select %p1648_p8, 1, 0 }
  0x41   : > { %s1062_s16 = sshll.u32 %s273_s19, 2  ;;  %s1657_s23 = scalar_lea.hbm %s1777_s0, %s1063_s20 }
  0x42   : > { %s277_s29 = scalar_lea.vmem [#allocation5], %s1062_s16  ;;  %p1659_p11 = pnand %p1170_p0, %p45_p5 }
  0x43   : > { %s284_s10 = sshll.u32 %s277_s29, 4  ;;  %s274_s13 = scalar_lea.sflag [#allocation6], %s273_s19  ;;  %s285_s10 = int_to_ptr.vmem [resolvable:$true] %s284_s10 }
  0x44   : > { %s1373_s15 = scalar_lea.hbm %s1657_s23, 64  ;;  %p1375_p1 = pneg %p1659_p11 }
  0x45   : > { %p1374_p7 = scmp.ne.s32.totalorder %s1657_s23, %s1373_s15  ;;  %s1378_s21 = scalar_lea.hbm %s1777_s0, 512 }
  0x46   : > { %p1379_p2 = scmp.lt.s32.totalorder %s1657_s23, %s1777_s0  ;;  %p1380_p4 = scmp.lt.s32.totalorder %s1378_s21, %s1373_s15 }
  0x47   : > { %p1376_p10 = pnand %p1375_p1, %p1374_p7 }
  0x48   : > { %p1381_p6 = por %p1380_p4, %p1379_p2 }
  0x49   : > { %p1377_p13 = pneg %p1376_p10 }
  0x4b   : > { %p1382_p12 = pnand %p1381_p6, %p1377_p13 }
  0x4d   : > { %1385 = shalt.err (!%p1382_p12)
}
  0x4e   : > { %s1386_s29 = scalar_lea.vmem %s285_s10, 64  ;;  %s1510_s19 = smov [#allocation5]  }
  0x4f   : > { %p1387_p0 = scmp.ne.s32.totalorder %s285_s10, %s1386_s29  ;;  %s1391_s1 = sshll.u32 %s1510_s19, 4  ;;  %s1392_s1 = int_to_ptr.vmem [resolvable:$false] %s1391_s1 }
  0x50   : > { %s1393_s2 = scalar_lea.vmem %s1392_s1, 128  ;;  %p1394_p7 = scmp.lt.s32.totalorder %s285_s10, %s1392_s1 }
  0x51   : > { %p1389_p5 = pnand %p1387_p0, %p1375_p1  ;;  %p1395_p10 = scmp.lt.s32.totalorder %s1393_s2, %s1386_s29 }
  0x53   : > { %p1390_p3 = pneg %p1389_p5  ;;  %p1396_p8 = por %p1395_p10, %p1394_p7 }
  0x55   : > { %p1397_p9 = pnand %p1396_p8, %p1390_p3 }
  0x57   : > { %1400 = shalt.err (!%p1397_p9)
}
  0x58   : > { %1159 = dma.hbm_to_vmem [thread:$0]  (!%p1659_p11), %s1657_s23, 64, %s285_s10, %s274_s13  }
  0x59   : > { %p1801_p13 = scmp.ne.s32.totalorder %s1794_s9, 0 }
  0x5a   : > { %s1680_s15 = sand.u32 (!%p1801_p13), 1, %s1495_s25   ;;  %p1802_p8 = scmp.ne.s32.totalorder (!%p1801_p13), %s1792_s30, 0 }
  0x5b   : > { %293 = sbr.rel (%p1801_p13) target bundleno = 434 (0x1b2), region = 44  ;;  %s1683_s12 = sshll.u32 (!%p1801_p13), %s1680_s15, 2 }
  0x5c   : > { %s296_s1 = scalar_lea.sflag (!%p1801_p13), [#allocation6], %s1680_s15  ;;  %s299_s2 = scalar_lea.vmem (!%p1801_p13), [#allocation5], %s1683_s12 }
  0x60   : > { %1470 = dma.done.wait (%p1802_p8), %s296_s1, 64  }
  0x61   : > { %1472 = vsyncadd (%p1802_p8), %s296_s1, 4294967232  ;;  %p1803_p9 = scmp.eq.s32.totalorder %s1575_s28, 0 }
  0x63   : > { %1474 = dma.done.wait (%p1803_p9), [#allocation9], 6144   ;;  %p1804_p11 = pmov %p1803_p9 }
  0x64   : > { %p1805_p1 = pmov %p1803_p9 }
  0x65   : > { %1476 = vsyncadd (%p1804_p11), [#allocation9], 4294961152 }
  0x66   : > { %1478 = dma.done.wait (%p1805_p1), [#allocation12], 64   ;;  %p1806_p2 = pmov %p1805_p1 }
  0x67   : > { %s339_s9 = scalar_lea.vmem [#allocation13], %s1683_s12  ;;  %s346_s23 = scalar_lea.vmem [#allocation14], %s1683_s12 }
  0x68   : > { %1480 = vsyncadd (%p1806_p2), [#allocation12], 4294967232  ;;  %p1807_p4 = scmp.ne.s32.totalorder %s1575_s28, 0 }
  0x6a   : > { %351 = sbr.rel (%p1807_p4) target bundleno = 123 (0x7b), region = 64 }
  0x6f   : > { %v352_v0 = vld [vmem:[#allocation11] sm:$0xf]  ;;  %v355_v1 = vld [vmem:[%s1782_s5] sm:$0xf]  ;;  %v361_v3 = vlaneseq }
  0x70   : > { %v358_v2 = vld [vmem:[%s1780_s3] sm:$0xf]  ;;  %v353_v4 = vunpack.c.l.bf16 %v352_v0  ;;  %v356_v5 = vunpack.c.l.bf16 %v355_v1 }
  0x71   : > { %v359_v6 = vunpack.c.l.bf16 %v358_v2  ;;  %v362_v7 = vshrl.u32 %v361_v3, 7 }
  0x72   : > { %354 = vst [vmem:[#allocation2] sm:$0xff] %v353_v4  ;;  %357 = vst [vmem:[#allocation3] sm:$0xff] %v356_v5 }
  0x73   : > { %v363_v8 = vsub.s32 0, %v362_v7  ;;  %v367_v9 = vsub.s32 2, %v362_v7  ;;  %v371_v10 = vsub.s32 4, %v362_v7  ;;  %v375_v11 = vsub.s32 6, %v362_v7 }
  0x75   : > { %v364_v12 = vrot.slane %v359_v6, %v363_v8  ;;  %v368_v13 = vrot.slane %v359_v6, %v367_v9  ;;  %v372_v14 = vrot.slane %v359_v6, %v371_v10  ;;  %v376_v15 = vrot.slane %v359_v6, %v375_v11 }
  0x77   : > { %v384_v16 = vrot.slane %v364_v12, %v363_v8  ;;  %v388_v17 = vrot.slane %v368_v13, %v363_v8  ;;  %v392_v18 = vrot.slane %v372_v14, %v363_v8  ;;  %v396_v19 = vrot.slane %v376_v15, %v363_v8 }
  0x79   : > { %397 = vst [vmem:[#allocation4 + $0x10] sm:$0xff] %v384_v16  ;;  %398 = vst [vmem:[#allocation4] sm:$0xff] %v388_v17 }
  0x7a   : > { %399 = vst [vmem:[#allocation4 + $0x18] sm:$0xff] %v392_v18  ;;  %400 = vst [vmem:[#allocation4 + $0x8] sm:$0xff] %v396_v19 }
  0x7b PF: > { %v1213_v20 = vld [vmem:[#allocation10 + $0xe4] ss:$16 sps:$4 sm:$0xff]   ;;  %v1215_v21 = vld [vmem:[#allocation10 + $0xec] ss:$16 sps:$4 sm:$0xff]   ;;  %v1511_v22 = vmov 0   ;;  %vm775_vm0 = vcmask 523264  }
  0x7c   : > { %645 = vmatprep.mubr.bf16.mxu0 %v1511_v22  ;;  %686 = vmatprep.mubr.bf16.mxu1 %v1511_v22  ;;  %v1217_v23 = vld [vmem:[#allocation10 + $0xe0] ss:$16 sps:$4 sm:$0xff]   ;;  %v1218_v24 = vld [vmem:[#allocation10 + $0xe8] ss:$16 sps:$4 sm:$0xff]   ;;  %v1219_v25 = vld [vmem:[#allocation10 + $0xc4] ss:$16 sps:$4 sm:$0xff]  }
  0x7d   : > { %613 = vmatprep.subr.bf16.mxu0 %v1213_v20  ;;  %654 = vmatprep.subr.bf16.mxu1 %v1215_v21  ;;  %v1221_v26 = vld [vmem:[#allocation10 + $0xcc] ss:$16 sps:$4 sm:$0xff]   ;;  %v1223_v27 = vld [vmem:[#allocation10 + $0xc0] ss:$16 sps:$4 sm:$0xff]   ;;  %v1224_v28 = vld [vmem:[#allocation10 + $0xc8] ss:$16 sps:$4 sm:$0xff]  }
  0x7e   : > { %614 = vmatpush1.bf16.msra.mxu0 %v1217_v23  ;;  %655 = vmatpush1.bf16.msra.mxu1 %v1218_v24  ;;  %v1225_v29 = vld [vmem:[#allocation10 + $0xa4] ss:$16 sps:$4 sm:$0xff]   ;;  %v1227_v30 = vld [vmem:[#allocation10 + $0xac] ss:$16 sps:$4 sm:$0xff]   ;;  %v1229_v31 = vld [vmem:[#allocation10 + $0xa0] ss:$16 sps:$4 sm:$0xff]  }
  0x7f   : > { %615 = vmatprep.subr.bf16.mxu0 %v1219_v25  ;;  %656 = vmatprep.subr.bf16.mxu1 %v1221_v26  ;;  %v1230_v32 = vld [vmem:[#allocation10 + $0xa8] ss:$16 sps:$4 sm:$0xff]   ;;  %v1231_v33 = vld [vmem:[#allocation10 + $0x84] ss:$16 sps:$4 sm:$0xff]   ;;  %v1233_v34 = vld [vmem:[#allocation10 + $0x8c] ss:$16 sps:$4 sm:$0xff]  }
  0x80   : > { %v1235_v35 = vld [vmem:[#allocation10 + $0x80] ss:$16 sps:$4 sm:$0xff]   ;;  %v1236_v36 = vld [vmem:[#allocation10 + $0x88] ss:$16 sps:$4 sm:$0xff]   ;;  %v1237_v37 = vld [vmem:[#allocation10 + $0x64] ss:$16 sps:$4 sm:$0xff]  }
  0x81   : > { %v1239_v38 = vld [vmem:[#allocation10 + $0x6c] ss:$16 sps:$4 sm:$0xff]   ;;  %v1241_v39 = vld [vmem:[#allocation10 + $0x60] ss:$16 sps:$4 sm:$0xff]   ;;  %v1242_v40 = vld [vmem:[#allocation10 + $0x68] ss:$16 sps:$4 sm:$0xff]  }
  0x82   : > { %616 = vmatpush1.bf16.msra.mxu0 %v1223_v27  ;;  %657 = vmatpush1.bf16.msra.mxu1 %v1224_v28  ;;  %v1243_v41 = vld [vmem:[#allocation10 + $0x44] ss:$16 sps:$4 sm:$0xff]   ;;  %v1245_v42 = vld [vmem:[#allocation10 + $0x4c] ss:$16 sps:$4 sm:$0xff]   ;;  %v1247_v43 = vld [vmem:[#allocation10 + $0x40] ss:$16 sps:$4 sm:$0xff]  }
  0x83   : > { %617 = vmatprep.subr.bf16.mxu0 %v1225_v29  ;;  %658 = vmatprep.subr.bf16.mxu1 %v1227_v30  ;;  %v1248_v44 = vld [vmem:[#allocation10 + $0x48] ss:$16 sps:$4 sm:$0xff]   ;;  %v1249_v45 = vld [vmem:[#allocation10 + $0x24] ss:$16 sps:$4 sm:$0xff]   ;;  %v1251_v46 = vld [vmem:[#allocation10 + $0x2c] ss:$16 sps:$4 sm:$0xff]  }
  0x84   : > { %v1253_v47 = vld [vmem:[#allocation10 + $0x20] ss:$16 sps:$4 sm:$0xff]   ;;  %v1254_v48 = vld [vmem:[#allocation10 + $0x28] ss:$16 sps:$4 sm:$0xff]   ;;  %v1255_v49 = vld [vmem:[#allocation10 + $0x4] ss:$16 sps:$4 sm:$0xff]  }
  0x85   : > { %v1257_v50 = vld [vmem:[#allocation10 + $0xc] ss:$16 sps:$4 sm:$0xff]   ;;  %v1259_v51 = vld [vmem:[#allocation10] ss:$16 sps:$4 sm:$0xff]   ;;  %v1260_v52 = vld [vmem:[#allocation10 + $0x8] ss:$16 sps:$4 sm:$0xff]  }
  0x86   : > { %618 = vmatpush1.bf16.msra.mxu0 %v1229_v31  ;;  %659 = vmatpush1.bf16.msra.mxu1 %v1230_v32  ;;  %v402_v53 = vld [vmem:[#allocation2] sm:$0xff]  ;;  %v1263_v54 = vld [vmem:[#allocation8 + $0x64] ss:$16 sps:$4 sm:$0xff]   ;;  %v1261_v57 = vld [vmem:[#allocation8 + $0x60] ss:$16 sps:$4 sm:$0xff]   ;;  %s1789_s20 = sshll.u32 %s1575_s28, 6 }
  0x87   : > { %619 = vmatprep.subr.bf16.mxu0 %v1231_v33  ;;  %660 = vmatprep.subr.bf16.mxu1 %v1233_v34  ;;  %v1266_v55 = vld [vmem:[#allocation8 + $0x6c] ss:$16 sps:$4 sm:$0xff]   ;;  %v420_v56 = vpack.c.bf16 %v402_v53, %v402_v53  ;;  %v1264_v58 = vld [vmem:[#allocation8 + $0x68] ss:$16 sps:$4 sm:$0xff]   ;;  %v1269_v59 = vld [vmem:[#allocation8 + $0x44] ss:$16 sps:$4 sm:$0xff]   ;;  %s923_s29 = scalar_lea.hbm %s1784_s7, %s1789_s20 }
  0x88   : > { %v1272_v60 = vld [vmem:[#allocation8 + $0x4c] ss:$16 sps:$4 sm:$0xff]   ;;  %v1267_v61 = vld [vmem:[#allocation8 + $0x40] ss:$16 sps:$4 sm:$0xff]   ;;  %v1270_v62 = vld [vmem:[#allocation8 + $0x48] ss:$16 sps:$4 sm:$0xff]  }
  0x89   : > { %v1275_v63 = vld [vmem:[#allocation8 + $0x24] ss:$16 sps:$4 sm:$0xff]   ;;  %v1278_v0 = vld [vmem:[#allocation8 + $0x2c] ss:$16 sps:$4 sm:$0xff]   ;;  %v1273_v1 = vld [vmem:[#allocation8 + $0x20] ss:$16 sps:$4 sm:$0xff]  }
  0x8a   : > { %620 = vmatpush1.bf16.msra.mxu0 %v1235_v35  ;;  %661 = vmatpush1.bf16.msra.mxu1 %v1236_v36  ;;  %v1276_v2 = vld [vmem:[#allocation8 + $0x28] ss:$16 sps:$4 sm:$0xff]   ;;  %v1281_v3 = vld [vmem:[#allocation8 + $0x4] ss:$16 sps:$4 sm:$0xff]   ;;  %v1284_v4 = vld [vmem:[#allocation8 + $0xc] ss:$16 sps:$4 sm:$0xff]  }
  0x8b   : > { %621 = vmatprep.subr.bf16.mxu0 %v1237_v37  ;;  %662 = vmatprep.subr.bf16.mxu1 %v1239_v38  ;;  %v1279_v5 = vld [vmem:[#allocation8] ss:$16 sps:$4 sm:$0xff]   ;;  %v1282_v6 = vld [vmem:[#allocation8 + $0x8] ss:$16 sps:$4 sm:$0xff]   ;;  %s925_s21 = sshll.u32 %s346_s23, 4  ;;  %s899_s19 = scalar_lea.sflag [#allocation15], %s1680_s15  ;;  %s926_s21 = int_to_ptr.vmem [resolvable:$true] %s925_s21 }
  0x8c   : > { %v401_v7 = vld [vmem:[%s299_s2] sm:$0xf]  ;;  %v861_v17 = vld [vmem:[#allocation4 + $0x10] sm:$0xff]  ;;  %v864_v30 = vld [vmem:[#allocation4 + $0x8] sm:$0xff]  ;;  %s1401_s1 = scalar_lea.vmem %s926_s21, 64  ;;  %p1808_p12 = scmp.ne.s32.totalorder %s1799_s18, 0 }
  0x8d   : > { %v862_v21 = vld [vmem:[#allocation4] sm:$0xff]  ;;  %v863_v36 = vld [vmem:[#allocation4 + $0x18] sm:$0xff]  ;;  %p1402_p6 = scmp.ne.s32.totalorder %s926_s21, %s1401_s1  ;;  %s1512_s2 = smov [#allocation14]  }
  0x8e   : > { %622 = vmatpush1.bf16.msra.mxu0 %v1241_v39  ;;  %663 = vmatpush1.bf16.msra.mxu1 %v1242_v40  ;;  %s1405_s30 = sshll.u32 %s1512_s2, 4  ;;  %s1406_s30 = int_to_ptr.vmem [resolvable:$false] %s1405_s30 }
  0x8f   : > { %623 = vmatprep.subr.bf16.mxu0 %v1243_v41  ;;  %664 = vmatprep.subr.bf16.mxu1 %v1245_v42  ;;  %p1403_p0 = pnand %p1402_p6, %p1808_p12  ;;  %s1407_s10 = scalar_lea.vmem %s1406_s30, 128 }
  0x90   : > { %p1408_p3 = scmp.lt.s32.totalorder %s926_s21, %s1406_s30  ;;  %p1409_p7 = scmp.lt.s32.totalorder %s1407_s10, %s1401_s1 }
  0x91   : > { %p1404_p5 = pneg %p1403_p0 }
  0x92   : > { %624 = vmatpush1.bf16.msra.mxu0 %v1247_v43  ;;  %665 = vmatpush1.bf16.msra.mxu1 %v1248_v44  ;;  %v403_v44 = vld [vmem:[#allocation3] sm:$0xff]  ;;  %p1410_p10 = por %p1409_p7, %p1408_p3 }
  0x93   : > { %625 = vmatprep.subr.bf16.mxu0 %v1249_v45  ;;  %666 = vmatprep.subr.bf16.mxu1 %v1251_v46 }
  0x94   : > { %p1411_p13 = pnand %p1410_p10, %p1404_p5 }
  0x96   : > { %626 = vmatpush1.bf16.msra.mxu0 %v1253_v47  ;;  %667 = vmatpush1.bf16.msra.mxu1 %v1254_v48 }
  0x97   : > { %627 = vmatprep.subr.bf16.mxu0 %v1255_v49  ;;  %668 = vmatprep.subr.bf16.mxu1 %v1257_v50 }
  0x9a   : > { %628 = vmatpush1.bf16.msra.mxu0 %v1259_v51  ;;  %669 = vmatpush1.bf16.msra.mxu1 %v1260_v52 }
  0x9b   : > { %787 = vmatprep.subr.bf16.mxu0 %v1263_v54  ;;  %828 = vmatprep.subr.bf16.mxu1 %v1266_v55 }
  0x9d   : > { %646 = vmatmul.mubr.bf16.vlgmr.msra.gmra.mxu0 %v420_v56  ;;  %687 = vmatmul.mubr.bf16.vlgmr.msra.gmra.mxu1 %v420_v56 }
  0x9e   : > { %788 = vmatpush1.bf16.msra.mxu0 %v1261_v57  ;;  %829 = vmatpush1.bf16.msra.mxu1 %v1264_v58 }
  0x9f   : > { %789 = vmatprep.subr.bf16.mxu0 %v1269_v59  ;;  %830 = vmatprep.subr.bf16.mxu1 %v1272_v60 }
  0xa0   : > { %811 = vmatprep.mubr.bf16.mxu0 %v1511_v22  ;;  %852 = vmatprep.mubr.bf16.mxu1 %v1511_v22 }
  0xa2   : > { %790 = vmatpush1.bf16.msra.mxu0 %v1267_v61  ;;  %831 = vmatpush1.bf16.msra.mxu1 %v1270_v62 }
  0xa3   : > { %791 = vmatprep.subr.bf16.mxu0 %v1275_v63  ;;  %832 = vmatprep.subr.bf16.mxu1 %v1278_v0 }
  0xa6   : > { %792 = vmatpush1.bf16.msra.mxu0 %v1273_v1  ;;  %833 = vmatpush1.bf16.msra.mxu1 %v1276_v2 }
  0xa7   : > { %793 = vmatprep.subr.bf16.mxu0 %v1281_v3  ;;  %834 = vmatprep.subr.bf16.mxu1 %v1284_v4 }
  0xaa   : > { %794 = vmatpush1.bf16.msra.mxu0 %v1279_v5  ;;  %835 = vmatpush1.bf16.msra.mxu1 %v1282_v6 }
  0xad   : > { %1120 = vmatmul.mubr.msk.bf16.vlgmr.msra.gmra.mxu0 %vm775_vm0, %v401_v7  ;;  %1121 = vmatmul.mubr.msk.bf16.vlgmr.msra.gmra.mxu1 %vm775_vm0, %v401_v7 }
 0x15d   : > { %v647_v8 = vpop.f32.mrf.mxu0  ;;  %v688_v9 = vpop.f32.mrf.mxu1 }
 0x15f   : > { %v649_v10 = vpop.f32.mrf.mxu0  ;;  %v690_v11 = vpop.f32.mrf.mxu1 }
 0x161   : > { %v651_v12 = vpop.f32.mrf.mxu0  ;;  %v692_v13 = vpop.f32.mrf.mxu1 }
 0x163   : > { %v652_v14 = vpop.f32.mrf.mxu0  ;;  %v693_v15 = vpop.f32.mrf.mxu1 }
 0x16d   : > { %v813_v16 = vpop.f32.mrf.mxu0  ;;  %v854_v18 = vpop.f32.mrf.mxu1 }
 0x16e   : > { %v814_v19 = vadd.f32 %v813_v16, %v647_v8  ;;  %v855_v35 = vadd.f32 %v854_v18, %v688_v9 }
 0x16f   : > { %v815_v20 = vpop.f32.mrf.mxu0  ;;  %v856_v22 = vpop.f32.mrf.mxu1 }
 0x170   : > { %v865_v23 = vadd.f32 %v861_v17, %v814_v19  ;;  %v816_v24 = vadd.f32 %v815_v20, %v649_v10  ;;  %v857_v29 = vadd.f32 %v856_v22, %v690_v11  ;;  %v867_v37 = vadd.f32 %v863_v36, %v855_v35 }
 0x171   : > { %v817_v25 = vpop.f32.mrf.mxu0  ;;  %v858_v26 = vpop.f32.mrf.mxu1 }
 0x172   : > { %v869_v27 = vmul.f32 0.5, %v865_v23  ;;  %v866_v28 = vadd.f32 %v862_v21, %v816_v24  ;;  %v868_v34 = vadd.f32 %v864_v30, %v857_v29  ;;  %v877_v38 = vmul.f32 0.5, %v867_v37 }
 0x173   : > { %v818_v31 = vpop.f32.mrf.mxu0  ;;  %v859_v32 = vpop.f32.mrf.mxu1 }
 0x174   : > { %1285 = vtanh.f32 %v869_v27  ;;  %v873_v33 = vmul.f32 0.5, %v866_v28 }
 0x176   : > { %1287 = vtanh.f32 %v873_v33 }
 0x177   : > { %1289 = vtanh.f32 %v868_v34 }
 0x178   : > { %1291 = vtanh.f32 %v877_v38 }
 0x181   : > { %v1286_v39 = vpop.eup %1285 }
 0x182   : > { %v871_v40 = vmul.f32 0.5, %v1286_v39 }
 0x183   : > { %v1288_v41 = vpop.eup %1287 }
 0x184   : > { %v872_v42 = vadd.f32 0.5, %v871_v40  ;;  %v875_v43 = vmul.f32 0.5, %v1288_v41  ;;  %v1290_v46 = vpop.eup %1289 }
 0x186   : > { %v876_v45 = vadd.f32 0.5, %v875_v43  ;;  %v883_v48 = vmul.f32 %v1290_v46, %v872_v42 }
 0x188   : > { %v882_v47 = vmul.f32 %v876_v45, %v403_v44 }
 0x18a   : > { %v884_v49 = vadd.f32 %v883_v48, %v882_v47 }
 0x18c   : > { %887 = vst [vmem:[#allocation3] sm:$0xff] %v884_v49  ;;  %1293 = vtanh.f32 %v884_v49  ;;  %v891_v50 = vpack.c.bf16 %v884_v49, %v884_v49 }
 0x18e   : > { %892 = vst [vmem:[%s346_s23] sm:$0xf] %v891_v50 }
 0x18f   : > { %1414 = shalt.err (!%p1411_p13)
}
 0x190   : > { %s1415_s11 = scalar_lea.hbm %s923_s29, 64  ;;  %s1419_s22 = scalar_lea.hbm %s1784_s7, 512 }
 0x191   : > { %p1416_p8 = scmp.ne.s32.totalorder %s923_s29, %s1415_s11  ;;  %p1420_p1 = scmp.lt.s32.totalorder %s923_s29, %s1784_s7 }
 0x192   : > { %p1421_p2 = scmp.lt.s32.totalorder %s1419_s22, %s1415_s11 }
 0x193   : > { %p1417_p9 = pnand %p1416_p8, %p1808_p12 }
 0x194   : > { %p1422_p4 = por %p1421_p2, %p1420_p1 }
 0x195   : > { %p1418_p11 = pneg %p1417_p9 }
 0x197   : > { %p1423_p6 = pnand %p1422_p4, %p1418_p11 }
 0x199   : > { %1426 = shalt.err (!%p1423_p6)
}
 0x19a   : > { %1143 = dma.vmem_to_hbm [thread:$0]  (%p1808_p12), %s926_s21, 64, %s923_s29, %s899_s19   ;;  %v1292_v51 = vpop.eup %1291 }
 0x19b   : > { %v879_v52 = vmul.f32 0.5, %v1292_v51  ;;  %v1294_v54 = vpop.eup %1293  ;;  %s912_s1 = sshll.u32 %s339_s9, 4  ;;  %s1809_s20 = sshll.u32 %s1575_s28, 6  ;;  %s913_s1 = int_to_ptr.vmem [resolvable:$true] %s912_s1 }
 0x19c   : > { %s910_s10 = scalar_lea.hbm %s1783_s6, %s1809_s20  ;;  %s894_s11 = scalar_lea.sflag [#allocation7], %s1680_s15 }
 0x19d   : > { %v880_v53 = vadd.f32 0.5, %v879_v52  ;;  %s1427_s23 = scalar_lea.vmem %s913_s1, 64  ;;  %s1513_s21 = smov [#allocation13]  }
 0x19e   : > { %p1428_p0 = scmp.ne.s32.totalorder %s913_s1, %s1427_s23  ;;  %s1431_s29 = sshll.u32 %s1513_s21, 4  ;;  %s1432_s29 = int_to_ptr.vmem [resolvable:$false] %s1431_s29 }
 0x19f   : > { %v886_v55 = vmul.f32 %v1294_v54, %v880_v53  ;;  %s1433_s19 = scalar_lea.vmem %s1432_s29, 128  ;;  %p1434_p7 = scmp.lt.s32.totalorder %s913_s1, %s1432_s29 }
 0x1a0   : > { %p1429_p5 = pnand %p1428_p0, %p1808_p12  ;;  %p1435_p10 = scmp.lt.s32.totalorder %s1433_s19, %s1427_s23 }
 0x1a1   : > { %888 = vst [vmem:[#allocation2] sm:$0xff] %v886_v55  ;;  %v889_v56 = vpack.c.bf16 %v886_v55, %v886_v55 }
 0x1a2   : > { %p1430_p3 = pneg %p1429_p5  ;;  %p1436_p13 = por %p1435_p10, %p1434_p7 }
 0x1a3   : > { %890 = vst [vmem:[%s339_s9] sm:$0xf] %v889_v56 }
 0x1a4   : > { %p1437_p8 = pnand %p1436_p13, %p1430_p3 }
 0x1a6   : > { %1440 = shalt.err (!%p1437_p8)
}
 0x1a7   : > { %s1441_s28 = scalar_lea.hbm %s910_s10, 64  ;;  %s1445_s9 = scalar_lea.hbm %s1783_s6, 512 }
 0x1a8   : > { %p1442_p9 = scmp.ne.s32.totalorder %s910_s10, %s1441_s28  ;;  %p1446_p2 = scmp.lt.s32.totalorder %s910_s10, %s1783_s6 }
 0x1a9   : > { %p1447_p4 = scmp.lt.s32.totalorder %s1445_s9, %s1441_s28 }
 0x1aa   : > { %p1443_p11 = pnand %p1442_p9, %p1808_p12 }
 0x1ab   : > { %p1448_p6 = por %p1447_p4, %p1446_p2 }
 0x1ac   : > { %p1444_p1 = pneg %p1443_p11 }
 0x1ae   : > { %p1449_p0 = pnand %p1448_p6, %p1444_p1 }
 0x1b0   : > { %1452 = shalt.err (!%p1449_p0)
}
 0x1b1   : > { %1142 = dma.vmem_to_hbm [thread:$0]  (%p1808_p12), %s913_s1, 64, %s910_s10, %s894_s11  }
 0x1b2 PF: > { %p1174_p5 = scmp.ge.s32.totalorder %s1503_s27, 2  ;;  %s937_s16 = sand.u32 1, %s1491_s24  }
 0x1b3   : > { %p1810_p3 = scmp.ne.s32.totalorder %s1793_s8, 0  ;;  %s938_s20 = scalar_lea.sflag [#allocation7], %s937_s16 }
 0x1b5   : > { %p1161_p7 = pnand %p1174_p5, %p1810_p3 }
 0x1b7   : > { %p1162_p10 = pneg %p1161_p7 }
 0x1b9   : > { %1482 = dma.done.wait (%p1162_p10), %s938_s20, 64  }
 0x1ba   : > { %1484 = vsyncadd (%p1162_p10), %s938_s20, 4294967232  ;;  %s947_s2 = scalar_lea.sflag [#allocation15], %s937_s16 }
 0x1bb   : > { %1486 = dma.done.wait (%p1162_p10), %s947_s2, 64  }
 0x1bc   : > { %1488 = vsyncadd (%p1162_p10), %s947_s2, 4294967232  ;;  %p26_p12 = scmp.ge.s32.totalorder %s1634_s14, 10   ;;  %s1811_s24 = smov %s1495_s25 }
 0x1bd   : > { %s1812_s25 = smov %s1499_s26  ;;  %s1813_s26 = smov %s1644_s17 }
 0x1be   : > { %s1814_s27 = smov %s1634_s14  ;;  %28 = sbr.rel (!%p26_p12) target bundleno = 12 (0xc), region = 122 }
 0x1c3   :  { %952 = vsyncpa [#allocation6], 1 }
 0x1c4   :  { %954 = vsyncpa [#allocation6 + $0x1], 1 }
 0x1c5   :  { %955 = vsyncpa [#allocation9], 1 }
 0x1c6   :  { %956 = vsyncpa [#allocation12], 1 }
 0x1c7   :  { %957 = vsyncpa [#allocation7], 1 }
 0x1c8   :  { %959 = vsyncpa [#allocation7 + $0x1], 1 }
 0x1c9   :  { %960 = vsyncpa [#allocation15], 1 }
 0x1ca   :  { %962 = vsyncpa [#allocation15 + $0x1], 1 }

</bundles_post_ra>
